<compile_context>
chip_gen: v7x
topology: tpu7x:2x2x1
jax: 0.10.0
libtpu: 0.0.40
codegen_flags: <defaults>
</compile_context>

<pallas_src>
import functools

import jax
import jax.numpy as jnp
from jax.experimental import pallas as pl
from jax.experimental.pallas import tpu as pltpu

_LANE = 128


def _actor_kernel(x_ref, w1_ref, b1_ref, w2_ref, b2_ref, o_ref, *, max_action):
    # Layer 1: (BM, D) @ (D, H) on the MXU, f32 accumulation; bias + ReLU on VPU.
    h = jnp.dot(x_ref[...], w1_ref[...], preferred_element_type=jnp.float32)
    h = jnp.maximum(h + b1_ref[...], 0.0)                       # (BM, H)

    # Layer 2: (BM, H) @ (H, out_pad) on the MXU; tanh runs on the EUP.
    a = jnp.dot(h, w2_ref[...], preferred_element_type=jnp.float32)
    a = jnp.tanh(a + b2_ref[...])                               # (BM, out_pad)

    o_ref[...] = (max_action * a).astype(o_ref.dtype)


def simple_actor_forward(state, w1, b1, w2, b2, max_action, *, block_m=2048):
    """state: (B, input_dim) -> actions: (B, output_dim), in [-max_action, max_action]."""
    B, D = state.shape
    H = w1.shape[1]
    out_dim = w2.shape[1]

    # --- batch tiling: collapse the grid when the batch is small/moderate ---
    if B <= block_m:
        bm = B                                   # single grid step
    else:
        bm = max(8, (block_m // 8) * 8)          # large 8-aligned tiles
    grid = (pl.cdiv(B, bm),)
    multi_step = grid[0] > 1

    # --- lane-dense output: pad action dim to 128 lanes (skip for huge B) ---
    if out_dim % _LANE != 0 and B * _LANE * 4 <= (32 << 20):
        out_pad = ((out_dim + _LANE - 1) // _LANE) * _LANE
    else:
        out_pad = out_dim
    if out_pad != out_dim:
        w2p = jnp.pad(w2, ((0, 0), (0, out_pad - out_dim)))
        b2p = jnp.pad(b2, ((0, out_pad - out_dim),))
    else:
        w2p, b2p = w2, b2

    cost = pl.CostEstimate(
        flops=2 * B * (D * H + H * out_dim),
        transcendentals=B * out_dim,
        bytes_accessed=4 * (B * D + D * H + H + H * out_pad + out_pad + B * out_pad),
    )

    kernel = functools.partial(_actor_kernel, max_action=float(max_action))

    out = pl.pallas_call(
        kernel,
        out_shape=jax.ShapeDtypeStruct((B, out_pad), jnp.float32),
        grid=grid,
        in_specs=[
            pl.BlockSpec((bm, D), lambda i: (i, 0)),          # state tiles (pipelined)
            pl.BlockSpec((D, H), lambda i: (0, 0)),           # w1, VMEM-resident
            pl.BlockSpec((1, H), lambda i: (0, 0)),           # b1 row
            pl.BlockSpec((H, out_pad), lambda i: (0, 0)),     # w2 (lane-padded)
            pl.BlockSpec((1, out_pad), lambda i: (0, 0)),     # b2 row (lane-padded)
        ],
        out_specs=pl.BlockSpec((bm, out_pad), lambda i: (i, 0)),
        compiler_params=pltpu.CompilerParams(
            # Shard the batch over v7x's two TCs only when there are >=2 real steps.
            dimension_semantics=("parallel",) if multi_step else ("arbitrary",),
        ),
        cost_estimate=cost,
    )(state, w1, b1.reshape(1, H), w2p, b2p.reshape(1, out_pad))

    return out[:, :out_dim] if out_pad != out_dim else out


def init_params(key, input_dim, output_dim, hidden_dim):
    """Deterministic parameter init matching SimpleActor.__init__."""
    k1, k2, k3, k4 = jax.random.split(key, 4)
    # nn.init.xavier_uniform_ on layer1.weight (fan_in=input_dim, fan_out=hidden_dim)
    limit = (6.0 / (input_dim + hidden_dim)) ** 0.5
    w1 = jax.random.uniform(k1, (input_dim, hidden_dim), jnp.float32, -limit, limit)
    # nn.Linear default bias init: U(-1/sqrt(fan_in), 1/sqrt(fan_in))
    b_lim1 = 1.0 / (input_dim ** 0.5)
    b1 = jax.random.uniform(k2, (hidden_dim,), jnp.float32, -b_lim1, b_lim1)
    # nn.init.uniform_(layer2.weight, -0.003, 0.003)
    w2 = jax.random.uniform(k3, (hidden_dim, output_dim), jnp.float32, -0.003, 0.003)
    b_lim2 = 1.0 / (hidden_dim ** 0.5)
    b2 = jax.random.uniform(k4, (output_dim,), jnp.float32, -b_lim2, b_lim2)
    return w1, b1, w2, b2


def _ref_forward(state, w1, b1, w2, b2, max_action):
    h = jnp.maximum(state @ w1 + b1, 0.0)
    return max_action * jnp.tanh(h @ w2 + b2)


if __name__ == "__main__":
    input_dim, output_dim, hidden_dim = 12, 4, 32
    max_action = 2.0

    key = jax.random.PRNGKey(0)
    kp, ks1, ks2 = jax.random.split(key, 3)
    w1, b1, w2, b2 = init_params(kp, input_dim, output_dim, hidden_dim)

    # Case 1: small batch -> single grid step (grid=(1,), bm=B), lane-padded output.
    batch = 64
    state = jax.random.normal(ks1, (batch, input_dim), jnp.float32)
    act = jax.block_until_ready(
        simple_actor_forward(state, w1, b1, w2, b2, max_action))
    act_ref = _ref_forward(state, w1, b1, w2, b2, max_action)
    assert act.shape == (batch, output_dim)
    assert jnp.allclose(act, act_ref, atol=1e-5, rtol=1e-5)

    # Case 2: ragged batch with multiple grid steps (exercises the batch grid +
    # padded last tile + "parallel" semantics).
    batch2 = 100
    state2 = jax.random.normal(ks2, (batch2, input_dim), jnp.float32)
    act2 = jax.block_until_ready(
        simple_actor_forward(state2, w1, b1, w2, b2, max_action, block_m=48))
    act2_ref = _ref_forward(state2, w1, b1, w2, b2, max_action)
    assert act2.shape == (batch2, output_dim)
    assert jnp.allclose(act2, act2_ref, atol=1e-5, rtol=1e-5)

    print("KERNEL_OK")
</pallas_src>

<mosaic_0001>
module attributes {stable_mosaic.version = 11 : i64} {
  func.func @_actor_kernel(%arg0: i32, %arg1: memref<64x12xf32, #tpu.memory_space<vmem>>, %arg2: memref<12x32xf32, #tpu.memory_space<vmem>>, %arg3: memref<1x32xf32, #tpu.memory_space<vmem>>, %arg4: memref<32x128xf32, #tpu.memory_space<vmem>>, %arg5: memref<1x128xf32, #tpu.memory_space<vmem>>, %arg6: memref<64x128xf32, #tpu.memory_space<vmem>>) attributes {dimension_semantics = [#tpu.dimension_semantics<arbitrary>], iteration_bounds = array<i64: 1>, scalar_prefetch = 0 : i64, scratch_operands = 0 : i64, tpu.core_type = #tpu.core_type<tc>, window_params = [{transform_indices = @transform_0, window_bounds = array<i64: 64, 12>}, {pipeline_mode = #tpu.pipeline_mode<synchronous>, transform_indices = @transform_1, window_bounds = array<i64: 12, 32>}, {pipeline_mode = #tpu.pipeline_mode<synchronous>, transform_indices = @transform_2, window_bounds = array<i64: 1, 32>}, {pipeline_mode = #tpu.pipeline_mode<synchronous>, transform_indices = @transform_3, window_bounds = array<i64: 32, 128>}, {pipeline_mode = #tpu.pipeline_mode<synchronous>, transform_indices = @transform_4, window_bounds = array<i64: 1, 128>}, {transform_indices = @transform_5, window_bounds = array<i64: 64, 128>}]} {
    %c0 = arith.constant 0 : index
    %c0_0 = arith.constant 0 : index
    %0 = vector.load %arg1[%c0, %c0_0] : memref<64x12xf32, #tpu.memory_space<vmem>>, vector<64x12xf32>
    %c0_1 = arith.constant 0 : index
    %c0_2 = arith.constant 0 : index
    %1 = vector.load %arg2[%c0_1, %c0_2] : memref<12x32xf32, #tpu.memory_space<vmem>>, vector<12x32xf32>
    %cst = arith.constant dense<0.000000e+00> : vector<64x32xf32>
    %2 = tpu.matmul %0, %1, %cst {dimension_numbers = #tpu.dot_dimension_numbers<[1], [0], [0], [1], [0, 0, 1, 1], [], []>} : vector<64x12xf32>, vector<12x32xf32>, vector<64x32xf32> -> vector<64x32xf32>
    %c0_3 = arith.constant 0 : index
    %c0_4 = arith.constant 0 : index
    %3 = vector.load %arg3[%c0_3, %c0_4] : memref<1x32xf32, #tpu.memory_space<vmem>>, vector<1x32xf32>
    %4 = vector.broadcast %3 : vector<1x32xf32> to vector<64x32xf32>
    %5 = arith.addf %2, %4 : vector<64x32xf32>
    %cst_5 = arith.constant 0.000000e+00 : f32
    %6 = vector.broadcast %cst_5 : f32 to vector<64x32xf32>
    %7 = arith.maximumf %5, %6 : vector<64x32xf32>
    %c0_6 = arith.constant 0 : index
    %c0_7 = arith.constant 0 : index
    %8 = vector.load %arg4[%c0_6, %c0_7] : memref<32x128xf32, #tpu.memory_space<vmem>>, vector<32x128xf32>
    %cst_8 = arith.constant dense<0.000000e+00> : vector<64x128xf32>
    %9 = tpu.matmul %7, %8, %cst_8 {dimension_numbers = #tpu.dot_dimension_numbers<[1], [0], [0], [1], [0, 0, 1, 1], [], []>} : vector<64x32xf32>, vector<32x128xf32>, vector<64x128xf32> -> vector<64x128xf32>
    %c0_9 = arith.constant 0 : index
    %c0_10 = arith.constant 0 : index
    %10 = vector.load %arg5[%c0_9, %c0_10] : memref<1x128xf32, #tpu.memory_space<vmem>>, vector<1x128xf32>
    %11 = vector.broadcast %10 : vector<1x128xf32> to vector<64x128xf32>
    %12 = arith.addf %9, %11 : vector<64x128xf32>
    %13 = math.tanh %12 : vector<64x128xf32>
    %cst_11 = arith.constant 2.000000e+00 : f32
    %14 = vector.broadcast %cst_11 : f32 to vector<64x128xf32>
    %15 = arith.mulf %14, %13 : vector<64x128xf32>
    %c0_12 = arith.constant 0 : index
    %c0_13 = arith.constant 0 : index
    %16 = vector.load %arg6[%c0_12, %c0_13] : memref<64x128xf32, #tpu.memory_space<vmem>>, vector<64x128xf32>
    tpu.vector_store %arg6[%c0_12, %c0_13], %15 {strides = array<i32>} : memref<64x128xf32, #tpu.memory_space<vmem>>, vector<64x128xf32>,
    return
  }
  func.func @transform_0(%arg0: i32) -> (i32, i32) {
    %c0_i32 = arith.constant 0 : i32
    %c0_i32_0 = arith.constant 0 : i32
    return %arg0, %c0_i32 : i32, i32
  }
  func.func @transform_1(%arg0: i32) -> (i32, i32) {
    %c0_i32 = arith.constant 0 : i32
    %c0_i32_0 = arith.constant 0 : i32
    %c0_i32_1 = arith.constant 0 : i32
    return %c0_i32, %c0_i32_0 : i32, i32
  }
  func.func @transform_2(%arg0: i32) -> (i32, i32) {
    %c0_i32 = arith.constant 0 : i32
    %c0_i32_0 = arith.constant 0 : i32
    %c0_i32_1 = arith.constant 0 : i32
    return %c0_i32, %c0_i32_0 : i32, i32
  }
  func.func @transform_3(%arg0: i32) -> (i32, i32) {
    %c0_i32 = arith.constant 0 : i32
    %c0_i32_0 = arith.constant 0 : i32
    %c0_i32_1 = arith.constant 0 : i32
    return %c0_i32, %c0_i32_0 : i32, i32
  }
  func.func @transform_4(%arg0: i32) -> (i32, i32) {
    %c0_i32 = arith.constant 0 : i32
    %c0_i32_0 = arith.constant 0 : i32
    %c0_i32_1 = arith.constant 0 : i32
    return %c0_i32, %c0_i32_0 : i32, i32
  }
  func.func @transform_5(%arg0: i32) -> (i32, i32) {
    %c0_i32 = arith.constant 0 : i32
    %c0_i32_0 = arith.constant 0 : i32
    return %arg0, %c0_i32 : i32, i32
  }
}

</mosaic_0001>

<bundles_post_ra>
// kernel: tpu_custom_call.1
= control target key start
LH: loop header
LB: loop body
LE: loop exit
PB: predicated region body
PF: predicated region fallthrough
CT: control target
= control target key end

     0   :  { %vm63_vm0 = vcmask 1043456   ;;  %vm496_vm1 = vmmov 1   ;;  %vm38_vm3 = vcmask 97280   ;;  %s606_s0 = inlined_call_operand.vmem [shape: f32[64,12], index: 0, kind: input, shape index: {}]   ;;  %s607_s1 = inlined_call_operand.vmem [shape: f32[12,32], index: 1, kind: input, shape index: {}]   ;;  %s608_s2 = inlined_call_operand.vmem [shape: f32[1,32], index: 2, kind: input, shape index: {}]   ;;  %s609_s3 = inlined_call_operand.vmem [shape: f32[32,128], index: 3, kind: input, shape index: {}]   ;;  %s610_s4 = inlined_call_operand.vmem [shape: f32[1,128], index: 4, kind: input, shape index: {}]   ;;  %s611_s5 = inlined_call_operand.hbm [shape: f32[64,128], index: 5, kind: output, shape index: {}]  }
   0x1   :  { %v29_v0 = vld [vmem:[%s607_s1] sm:$0xff]  ;;  %v30_v1 = vld [vmem:[%s607_s1 + $0x8] sm:$0xf]  ;;  %vm439_vm2 = vmpackc.low %vm63_vm0, %vm496_vm1 }
   0x2   :  { %v21_v2 = vld [vmem:[%s606_s0] sm:$0xff]  ;;  %v438_v3 = vpack.c.bf16 %v30_v1, %v29_v0  ;;  %v22_v5 = vld [vmem:[%s606_s0 + $0x8] sm:$0xff] }
   0x3   :  { %406 = vmatprep.mubr.msk.f32.mxu0 %vm38_vm3, %v21_v2  ;;  %v180_v4 = vld [vmem:[%s609_s3] sm:$0xff]  ;;  %v181_v6 = vld [vmem:[%s609_s3 + $0x8] sm:$0xff] }
   0x4   :  { %440 = vmatprep.subr.msk.bf16.mxu0 %vm439_vm2, %v438_v3 }
   0x5   :  { %443 = vmatpush3.bf16.msk.msra.mxu0 %vm439_vm2, %v438_v3 }
   0x6   :  { %10 = vsyncpa [#allocation3], 0  ;;  %v23_v7 = vld [vmem:[%s606_s0 + $0x10] sm:$0xff]  ;;  %v444_v8 = vpack.c.bf16 %v181_v6, %v180_v4  ;;  %v24_v9 = vld [vmem:[%s606_s0 + $0x18] sm:$0xff]  ;;  %vm191_vm4 = vcmask 261120  }
   0x7   :  { %v25_v10 = vld [vmem:[%s606_s0 + $0x20] sm:$0xff]  ;;  %v26_v11 = vld [vmem:[%s606_s0 + $0x28] sm:$0xff]  ;;  %v27_v12 = vld [vmem:[%s606_s0 + $0x30] sm:$0xff] }
   0x8   :  { %407 = vmatmul.mubr.msk.f32.vlgmr.msra.gmra.mrb[0].mxu0 %vm38_vm3, %v22_v5  ;;  %445 = vmatprep.subr.bf16.mxu1 %v444_v8  ;;  %v28_v13 = vld [vmem:[%s606_s0 + $0x38] sm:$0xff]  ;;  %v182_v14 = vld [vmem:[%s609_s3 + $0x10] sm:$0xff]  ;;  %v361_v17 = vld [vmem:[%s608_s2] ss:$0 sm:$0xff] }
   0x9   :  { %409 = vmatprep.mubr.msk.f32.mxu0 %vm38_vm3, %v23_v7  ;;  %447 = vmatpush3.bf16.msra.mxu1 %v444_v8  ;;  %v183_v15 = vld [vmem:[%s609_s3 + $0x18] sm:$0xff]  ;;  %v371_v42 = vld [vmem:[%s610_s4] ss:$0 sm:$0xff]  ;;  %s497_s3 = smov [#allocation2]  }
   0xa   :  { %v448_v16 = vpack.c.bf16 %v183_v15, %v182_v14  ;;  %s350_s4 = sshll.u32 %s497_s3, 4  ;;  %s351_s4 = int_to_ptr.vmem [resolvable:$true] %s350_s4 }
   0xb   :  { %s472_s22 = scalar_lea.vmem %s351_s4, 1024  ;;  %p477_p1 = scmp.lt.s32.totalorder %s351_s4, %s351_s4 }
   0xc   :  { %410 = vmatmul.mubr.msk.f32.gmra.mrb[2].mxu0 %vm38_vm3, %v24_v9  ;;  %449 = vmatprep.subr.bf16.mxu1 %v448_v16  ;;  %p473_p0 = scmp.ne.s32.totalorder %s351_s4, %s472_s22  ;;  %p478_p2 = scmp.lt.s32.totalorder %s472_s22, %s472_s22 }
   0xd   :  { %412 = vmatprep.mubr.msk.f32.mxu0 %vm38_vm3, %v25_v10  ;;  %451 = vmatpush3.bf16.msra.mxu1 %v448_v16 }
   0xe   :  { %p479_p3 = por %p478_p2, %p477_p1 }
  0x10   :  { %413 = vmatmul.mubr.msk.f32.gmra.mrb[4].mxu0 %vm38_vm3, %v26_v11  ;;  %p480_p4 = pnand %p479_p3, %p473_p0 }
  0x11   :  { %415 = vmatprep.mubr.msk.f32.mxu0 %vm38_vm3, %v27_v12 }
  0x14   :  { %416 = vmatmul.mubr.msk.f32.gmra.mrb[6].mxu0 %vm38_vm3, %v28_v13 }
  0xdb   :  { %v408_v18 = vpop.f32.mrb[0].mxu0 }
  0xdc   :  { %v139_v19 = vadd.f32 %v408_v18, %v361_v17  ;;  %v133_v20 = vpop.f32.mrb[1].mxu0 }
  0xdd   :  { %v134_v21 = vadd.f32 %v361_v17, %v133_v20 }
  0xde   :  { %v173_v24 = vmax.f32 %v139_v19, 0.0 }
  0xdf   :  { %v172_v22 = vmax.f32 %v134_v21, 0.0  ;;  %v411_v23 = vpop.f32.mrb[2].mxu0 }
  0xe0   :  { %v149_v25 = vadd.f32 %v411_v23, %v361_v17  ;;  %v143_v26 = vpop.f32.mrb[3].mxu0 }
  0xe1   :  { %v144_v27 = vadd.f32 %v361_v17, %v143_v26  ;;  %426 = vmatprep.mubr.msk.f32.mxu1 %vm191_vm4, %v172_v22 }
  0xe2   :  { %427 = vmatmul.mubr.msk.f32.vlgmr.msra.gmra.mrb[0].mxu1 %vm191_vm4, %v173_v24  ;;  %v175_v30 = vmax.f32 %v149_v25, 0.0 }
  0xe3   :  { %v174_v28 = vmax.f32 %v144_v27, 0.0  ;;  %v414_v29 = vpop.f32.mrb[4].mxu0 }
  0xe4   :  { %v159_v31 = vadd.f32 %v414_v29, %v361_v17  ;;  %v153_v32 = vpop.f32.mrb[5].mxu0 }
  0xe5   :  { %v154_v33 = vadd.f32 %v361_v17, %v153_v32  ;;  %429 = vmatprep.mubr.msk.f32.mxu1 %vm191_vm4, %v174_v28 }
  0xe6   :  { %430 = vmatmul.mubr.msk.f32.gmra.mrb[2].mxu1 %vm191_vm4, %v175_v30  ;;  %v177_v36 = vmax.f32 %v159_v31, 0.0 }
  0xe7   :  { %v176_v34 = vmax.f32 %v154_v33, 0.0  ;;  %v417_v35 = vpop.f32.mrb[6].mxu0 }
  0xe8   :  { %v169_v37 = vadd.f32 %v417_v35, %v361_v17  ;;  %v163_v38 = vpop.f32.mrb[7].mxu0 }
  0xe9   :  { %v164_v39 = vadd.f32 %v361_v17, %v163_v38  ;;  %432 = vmatprep.mubr.msk.f32.mxu1 %vm191_vm4, %v176_v34 }
  0xea   :  { %433 = vmatmul.mubr.msk.f32.gmra.mrb[4].mxu1 %vm191_vm4, %v177_v36  ;;  %v179_v41 = vmax.f32 %v169_v37, 0.0 }
  0xeb   :  { %v178_v40 = vmax.f32 %v164_v39, 0.0 }
  0xed   :  { %435 = vmatprep.mubr.msk.f32.mxu1 %vm191_vm4, %v178_v40 }
  0xee   :  { %436 = vmatmul.mubr.msk.f32.gmra.mrb[6].mxu1 %vm191_vm4, %v179_v41 }
 0x1b5   :  { %v428_v43 = vpop.f32.mrb[0].mxu1 }
 0x1b6   :  { %v288_v44 = vadd.f32 %v428_v43, %v371_v42  ;;  %v282_v45 = vpop.f32.mrb[1].mxu1 }
 0x1b7   :  { %v283_v46 = vadd.f32 %v371_v42, %v282_v45 }
 0x1b8   :  { %456 = vtanh.f32 %v288_v44 }
 0x1b9   :  { %458 = vtanh.f32 %v283_v46  ;;  %v431_v47 = vpop.f32.mrb[2].mxu1 }
 0x1ba   :  { %v298_v48 = vadd.f32 %v431_v47, %v371_v42  ;;  %v292_v49 = vpop.f32.mrb[3].mxu1 }
 0x1bb   :  { %v293_v50 = vadd.f32 %v371_v42, %v292_v49 }
 0x1bc   :  { %460 = vtanh.f32 %v298_v48 }
 0x1bd   :  { %462 = vtanh.f32 %v293_v50  ;;  %v434_v51 = vpop.f32.mrb[4].mxu1 }
 0x1be   :  { %v308_v52 = vadd.f32 %v434_v51, %v371_v42  ;;  %v302_v53 = vpop.f32.mrb[5].mxu1 }
 0x1bf   :  { %v303_v54 = vadd.f32 %v371_v42, %v302_v53 }
 0x1c0   :  { %464 = vtanh.f32 %v308_v52 }
 0x1c1   :  { %466 = vtanh.f32 %v303_v54  ;;  %v437_v55 = vpop.f32.mrb[6].mxu1 }
 0x1c2   :  { %v457_v56 = vpop.eup %456  ;;  %v318_v57 = vadd.f32 %v437_v55, %v371_v42  ;;  %v312_v58 = vpop.f32.mrb[7].mxu1 }
 0x1c3   :  { %v459_v59 = vpop.eup %458  ;;  %v330_v60 = vmul.f32 2.0, %v457_v56  ;;  %v313_v61 = vadd.f32 %v371_v42, %v312_v58 }
 0x1c4   :  { %v329_v62 = vmul.f32 2.0, %v459_v59  ;;  %468 = vtanh.f32 %v318_v57 }
 0x1c5   :  { %338 = vst [vmem:[#allocation2 + $0x8] sm:$0xff] %v330_v60  ;;  %470 = vtanh.f32 %v313_v61 }
 0x1c6   :  { %v461_v63 = vpop.eup %460  ;;  %337 = vst [vmem:[#allocation2] sm:$0xff] %v329_v62 }
 0x1c7   :  { %v463_v0 = vpop.eup %462  ;;  %v332_v1 = vmul.f32 2.0, %v461_v63 }
 0x1c8   :  { %v331_v2 = vmul.f32 2.0, %v463_v0 }
 0x1c9   :  { %340 = vst [vmem:[#allocation2 + $0x18] sm:$0xff] %v332_v1 }
 0x1ca   :  { %v465_v3 = vpop.eup %464  ;;  %339 = vst [vmem:[#allocation2 + $0x10] sm:$0xff] %v331_v2 }
 0x1cb   :  { %v467_v4 = vpop.eup %466  ;;  %v334_v5 = vmul.f32 2.0, %v465_v3 }
 0x1cc   :  { %v333_v6 = vmul.f32 2.0, %v467_v4 }
 0x1cd   :  { %342 = vst [vmem:[#allocation2 + $0x28] sm:$0xff] %v334_v5 }
 0x1ce   :  { %v469_v7 = vpop.eup %468  ;;  %341 = vst [vmem:[#allocation2 + $0x20] sm:$0xff] %v333_v6 }
 0x1cf   :  { %v471_v8 = vpop.eup %470  ;;  %v336_v9 = vmul.f32 2.0, %v469_v7 }
 0x1d0   :  { %v335_v10 = vmul.f32 2.0, %v471_v8 }
 0x1d1   :  { %344 = vst [vmem:[#allocation2 + $0x38] sm:$0xff] %v336_v9 }
 0x1d2   :  { %343 = vst [vmem:[#allocation2 + $0x30] sm:$0xff] %v335_v10 }
 0x1d3   :  { %483 = shalt.err (!%p480_p4)
}
 0x1d4   :  { %s484_s25 = scalar_lea.hbm %s611_s5, 1024 }
 0x1d5   :  { %p485_p5 = scmp.ne.s32.totalorder %s611_s5, %s484_s25  ;;  %p488_p6 = scmp.lt.u32.totalorder %s484_s25, %s611_s5 }
 0x1d7   :  { %p490_p7 = pnand %p488_p6, %p485_p5 }
 0x1d9   :  { %493 = shalt.err (!%p490_p7)
}
 0x1da   :  { %s498_s29 = smov 128   ;;  %s499_s30 = smov 8  }
 0x1db   :  { %356 = dma.vmem_to_hbm [thread:$0]  %s351_s4, 1024, %s611_s5, [#allocation3], %s498_s29, %s498_s29, %s499_s30  }
 0x1dc   :  { %494 = dma.done.wait [#allocation3], 1024  }
 0x1dd   :  { %495 = vsyncadd [#allocation3], 4294966272 }
 0x1de   :  { %360 = vsyncpa [#allocation3], 1 }

</bundles_post_ra>
